<compile_context>
chip_gen: v5e
topology: v5e:2x2
jax: 0.10.0
libtpu: 0.0.40
codegen_flags: <defaults>
</compile_context>

<pallas_src>
import math
from functools import partial

import jax
import jax.numpy as jnp
from jax.experimental import pallas as pl
from jax.experimental.pallas import tpu as pltpu


def _round_up(x, m):
    return ((x + m - 1) // m) * m


def _device_kind():
    try:
        return jax.devices()[0].device_kind.lower()
    except Exception:
        return ""


_KIND = _device_kind()
_IS_V7X = "v7" in _KIND
_IS_V5E = ("v5e" in _KIND) or ("v5 lite" in _KIND) or ("v5litepod" in _KIND)

# ----------------------------------------------------------------------------
# EMA / forward tiling configuration (generation-aware, perf-only)
# ----------------------------------------------------------------------------
_LANE = 512  # lane-dense last dim of the state slab (multiple of 128)
# v5e: 128 MiB VMEM + lowest HBM BW -> largest tiles (8 MiB blocks).
# v6e/v7x: 2048 rows = 4 MiB blocks; 3 arrays x 2 buffers ~= 24 MiB live,
# which fits v7x's 64 MiB VMEM with headroom.
_MAX_BLOCK_ROWS = 4096 if _IS_V5E else 2048
_VMEM_LIMIT = (64 if _IS_V5E else 48) * 1024 * 1024
# Forward M-tile target (MXU): 128 on v5e (4x128x128 MXU), 256 on v6e/v7x.
_TM_TARGET = 128 if _IS_V5E else 256


# ----------------------------------------------------------------------------
# EMA update: one fused, tiled, in-place, lane-dense kernel over the whole
# state slab.  ema = d * ema + (1 - d) * model
# ----------------------------------------------------------------------------
def _ema_kernel(decay_ref, ema_ref, model_ref, out_ref):
    d = decay_ref[0]                          # SMEM scalar: decay schedules don't recompile
    m = model_ref[...].astype(jnp.float32)    # model slab may be bf16; upcast on the VPU
    out_ref[...] = d * ema_ref[...] + (1.0 - d) * m


@partial(jax.jit, static_argnames=("block_rows", "core_parallel"), donate_argnums=(1,))
def _ema_update_slab(decay_arr, ema_slab, model_slab, *, block_rows, core_parallel):
    rows, lane = ema_slab.shape
    sem = (pltpu.CORE_PARALLEL if core_parallel else pltpu.PARALLEL,)
    return pl.pallas_call(
        _ema_kernel,
        out_shape=jax.ShapeDtypeStruct((rows, lane), ema_slab.dtype),
        grid=(rows // block_rows,),
        in_specs=[
            pl.BlockSpec(memory_space=pltpu.MemorySpace.SMEM),   # decay scalar
            pl.BlockSpec((block_rows, lane), lambda i: (i, 0)),  # ema slab
            pl.BlockSpec((block_rows, lane), lambda i: (i, 0)),  # model slab
        ],
        out_specs=pl.BlockSpec((block_rows, lane), lambda i: (i, 0)),
        # write the new EMA in place over the old EMA buffer (input index 1)
        input_output_aliases={1: 0},
        compiler_params=pltpu.CompilerParams(
            dimension_semantics=sem,
            vmem_limit_bytes=_VMEM_LIMIT,
        ),
    )(decay_arr, ema_slab, model_slab)


# ----------------------------------------------------------------------------
# Slab layout: fixed-order packing of a float state_dict into [rows, 512] f32.
# ----------------------------------------------------------------------------
class ParamLayout:
    def __init__(self, params):
        items = {k: jnp.asarray(v) for k, v in params.items()}
        self.keys = [k for k, v in items.items() if jnp.issubdtype(v.dtype, jnp.floating)]
        # TODO(synk): non-float state (e.g. BatchNorm num_batches_tracked) must be
        # copied verbatim, never EMA-averaged; it lives outside the slab.
        self.other_keys = [k for k in items if k not in self.keys]
        self.shapes = [tuple(items[k].shape) for k in self.keys]
        self.dtypes = [items[k].dtype for k in self.keys]
        self.sizes = [math.prod(s) for s in self.shapes]
        total = sum(self.sizes)
        rows = -(-total // _LANE)
        self.block_rows = min(_MAX_BLOCK_ROWS, _round_up(max(rows, 8), 8))
        self.rows = _round_up(rows, self.block_rows)

    def flatten(self, params):
        """One-time dict -> slab packing (NOT on the per-step EMA hot path)."""
        parts = [jnp.asarray(params[k]).astype(jnp.float32).reshape(-1) for k in self.keys]
        flat = jnp.concatenate(parts)
        pad = self.rows * _LANE - flat.shape[0]
        if pad:
            flat = jnp.pad(flat, (0, pad))
        return flat.reshape(self.rows, _LANE)

    def unflatten(self, slab):
        vec = slab.reshape(-1)
        out, off = {}, 0
        for k, shape, dtype, n in zip(self.keys, self.shapes, self.dtypes, self.sizes):
            out[k] = vec[off:off + n].reshape(shape).astype(dtype)
            off += n
        return out


# ----------------------------------------------------------------------------
# Fused forward: Flatten -> fc1 -> ReLU -> fc2 in ONE pallas_call.
# Weights are pre-staged (padded, k-major [in, out], lane-dense N) once per
# EMA snapshot, so the kernel's RHS needs no pad/transpose on the hot path.
# ----------------------------------------------------------------------------
def _mlp_kernel(x_ref, w1_ref, b1_ref, w2_ref, b2_ref, o_ref):
    h = jnp.dot(x_ref[...], w1_ref[...], preferred_element_type=jnp.float32)
    h = jnp.maximum(h + b1_ref[...].astype(jnp.float32), 0.0)
    y = jnp.dot(h.astype(w2_ref.dtype), w2_ref[...], preferred_element_type=jnp.float32)
    o_ref[...] = (y + b2_ref[...].astype(jnp.float32)).astype(o_ref.dtype)


@partial(jax.jit, static_argnames=("out_features",))
def _mlp_forward(x, w1_kn, b1, w2_kn, b2, *, out_features):
    B = x.shape[0]
    xf = x.reshape(B, -1)                      # Flatten: NCHW -> [B, C*H*W]
    IN = xf.shape[1]
    INp, Hp = w1_kn.shape
    OUTp = w2_kn.shape[1]
    tm = min(_TM_TARGET, _round_up(B, 8))      # proper M tile; no gcd collapse to 8
    Bp = _round_up(B, tm)
    xp = jnp.pad(xf, ((0, Bp - B), (0, INp - IN)))
    # TODO(synk): for very large in_features add a K grid axis + VMEM accumulator;
    # this model's IN (1024) fits fully in VMEM per M tile.
    yp = pl.pallas_call(
        _mlp_kernel,
        out_shape=jax.ShapeDtypeStruct((Bp, OUTp), x.dtype),
        grid=(Bp // tm,),
        in_specs=[
            pl.BlockSpec((tm, INp), lambda i: (i, 0)),    # x tile
            pl.BlockSpec((INp, Hp), lambda i: (0, 0)),    # fc1 weight [in, hid] (k-major)
            pl.BlockSpec((1, Hp), lambda i: (0, 0)),      # fc1 bias
            pl.BlockSpec((Hp, OUTp), lambda i: (0, 0)),   # fc2 weight [hid, out]
            pl.BlockSpec((1, OUTp), lambda i: (0, 0)),    # fc2 bias
        ],
        out_specs=pl.BlockSpec((tm, OUTp), lambda i: (i, 0)),
        compiler_params=pltpu.CompilerParams(
            dimension_semantics=("parallel",),
            vmem_limit_bytes=_VMEM_LIMIT,
        ),
    )(xp, w1_kn, b1, w2_kn, b2)
    return yp[:B, :out_features]


def _prepare_mlp_weights(params):
    """Pad + pre-transpose the EMA weights once per snapshot (not per forward)."""
    w1, b1 = params["fc1.weight"], params["fc1.bias"]
    w2, b2 = params["fc2.weight"], params["fc2.bias"]
    H, IN = w1.shape
    OUT = w2.shape[0]
    INp, Hp, OUTp = _round_up(IN, 128), _round_up(H, 128), _round_up(OUT, 128)
    w1_kn = jnp.pad(w1.T, ((0, INp - IN), (0, Hp - H)))       # [INp, Hp]
    b1_p = jnp.pad(b1, (0, Hp - H)).reshape(1, Hp)
    w2_kn = jnp.pad(w2.T, ((0, Hp - H), (0, OUTp - OUT)))     # [Hp, OUTp]
    b2_p = jnp.pad(b2, (0, OUTp - OUT)).reshape(1, OUTp)
    return (w1_kn, b1_p, w2_kn, b2_p, OUT)


# ----------------------------------------------------------------------------
# The wrapped model (stands in for the PyTorch `model`).  It keeps its float
# state as the SAME fused slab layout the EMA uses, so ema.update() never
# flattens/concats a state_dict on the hot path.
# ----------------------------------------------------------------------------
class SmallModel:
    """Flatten -> Linear -> ReLU -> Linear; float state lives in one slab."""

    def __init__(self, key, in_features, hidden, out_features, dtype=jnp.float32):
        k1, k2, k3, k4 = jax.random.split(key, 4)
        s1 = 1.0 / math.sqrt(in_features)
        s2 = 1.0 / math.sqrt(hidden)
        params = {
            "fc1.weight": jax.random.uniform(k1, (hidden, in_features), dtype, -s1, s1),
            "fc1.bias": jax.random.uniform(k2, (hidden,), dtype, -s1, s1),
            "fc2.weight": jax.random.uniform(k3, (out_features, hidden), dtype, -s2, s2),
            "fc2.bias": jax.random.uniform(k4, (out_features,), dtype, -s2, s2),
        }
        self.layout = ParamLayout(params)
        self.flat = self.layout.flatten(params)   # one-time flatten at model build
        self.other = {}                           # non-float buffers (none here)

    @property
    def params(self):
        return self.layout.unflatten(self.flat)


# ----------------------------------------------------------------------------
# ModelEMA (JAX/Pallas version)
# ----------------------------------------------------------------------------
class ModelEMA:
    """EMA of the whole float state as one fused lane-dense f32 slab."""

    def __init__(self, model, decay=None, half_life=None, device=None):
        assert (decay is None) ^ (half_life is None), "either decay or half_life must be None"
        if half_life is not None:
            decay = math.exp(-math.log(2) / half_life)
        if decay <= 0.0 or decay >= 1.0:
            raise ValueError("Decay must be between 0 and 1")
        self.decay = float(decay)
        self.half_life = half_life
        self.device = device  # TODO(synk): device pinning is jax.device_put placement, not replicated here
        self._decay_arr = jnp.array([self.decay], jnp.float32)

        self.layout = model.layout
        # copy.deepcopy(model): independent f32 master slab (a real copy, so
        # donating the EMA buffer can never invalidate the live model's buffer).
        self.flat = jnp.copy(model.flat).astype(jnp.float32)
        # Non-float buffers are copied verbatim, never averaged.
        self.other = dict(getattr(model, "other", {}) or {})

        self._core_parallel = _IS_V7X   # engage both TensorCores on v7x
        self._params_cache = None
        self._fwd_cache = None

    def _invalidate(self):
        self._params_cache = None
        self._fwd_cache = None

    @property
    def params(self):
        if self._params_cache is None:
            p = self.layout.unflatten(self.flat)
            p.update(self.other)
            self._params_cache = p
        return self._params_cache

    # ---- EMA ops (hot path: slab in, slab out; zero per-step flatten) ----
    def update(self, model):
        self._invalidate()
        self.other = dict(getattr(model, "other", {}) or {})
        try:
            self.flat = _ema_update_slab(
                self._decay_arr, self.flat, model.flat,
                block_rows=self.layout.block_rows,
                core_parallel=self._core_parallel)
        except Exception:
            if not self._core_parallel:
                raise
            # fall back to plain PARALLEL semantics if CORE_PARALLEL is unsupported
            self._core_parallel = False
            self.flat = _ema_update_slab(
                self._decay_arr, self.flat, model.flat,
                block_rows=self.layout.block_rows, core_parallel=False)

    def set(self, model):
        self._invalidate()
        self.other = dict(getattr(model, "other", {}) or {})
        self.flat = jnp.copy(model.flat).astype(jnp.float32)

    # ---- forward(*args) == run the EMA copy of the wrapped model ----
    def __call__(self, x):
        if self._fwd_cache is None:
            self._fwd_cache = _prepare_mlp_weights(self.params)
        w1_kn, b1, w2_kn, b2, out_features = self._fwd_cache
        return _mlp_forward(x, w1_kn, b1, w2_kn, b2, out_features=out_features)


# ----------------------------------------------------------------------------
if __name__ == "__main__":
    key = jax.random.PRNGKey(0)
    B, C, H, W = 2, 4, 16, 16
    hidden, out_features = 32, 16
    in_features = C * H * W

    kp, kq, kx = jax.random.split(key, 3)
    model = SmallModel(kp, in_features, hidden, out_features)

    decay = 0.999
    ema = ModelEMA(model, decay=decay)

    params0 = model.params  # snapshot for the pure-JAX reference

    # one "optimizer step" on the live model, applied directly on its slab view
    # (so the subsequent ema.update() moves no extra state bytes).
    noise = 0.01 * jax.random.normal(kq, model.flat.shape, model.flat.dtype)
    model.flat = model.flat + noise
    new_params = model.params

    ema.update(model)

    # check EMA update against pure-JAX reference
    ref1 = {k: decay * params0[k] + (1.0 - decay) * new_params[k] for k in params0}
    ema_params = ema.params
    for k in params0:
        assert jnp.allclose(ema_params[k], ref1[k], atol=1e-6), f"EMA mismatch for {k}"

    # second update exercises the in-place (aliased + donated) path again
    ema.update(model)
    ref2 = {k: decay * ref1[k] + (1.0 - decay) * new_params[k] for k in params0}
    ema_params = ema.params
    for k in params0:
        assert jnp.allclose(ema_params[k], ref2[k], atol=1e-6), f"EMA mismatch (2) for {k}"

    # forward pass through the EMA module (fused Flatten->fc1->ReLU->fc2 kernel)
    x = jax.random.normal(kx, (B, C, H, W), jnp.float32)
    y = ema(x)
    jax.block_until_ready(y)

    # check forward against pure-JAX reference
    xf = x.reshape(B, -1)
    h_ref = jnp.maximum(xf @ ema_params["fc1.weight"].T + ema_params["fc1.bias"], 0.0)
    y_ref = h_ref @ ema_params["fc2.weight"].T + ema_params["fc2.bias"]
    assert y.shape == (B, out_features)
    assert jnp.allclose(y, y_ref, atol=1e-4, rtol=1e-4), "forward mismatch"

    print("KERNEL_OK")
</pallas_src>

<mosaic_0001>
module attributes {stable_mosaic.version = 11 : i64} {
  func.func @_ema_kernel(%arg0: i32, %arg1: memref<1xf32, #tpu.memory_space<smem>>, %arg2: memref<72x512xf32, #tpu.memory_space<vmem>>, %arg3: memref<72x512xf32, #tpu.memory_space<vmem>>, %arg4: memref<72x512xf32, #tpu.memory_space<vmem>>) attributes {dimension_semantics = [#tpu.dimension_semantics<parallel>], iteration_bounds = array<i64: 1>, scalar_prefetch = 0 : i64, scratch_operands = 0 : i64, tpu.core_type = #tpu.core_type<tc>, window_params = [{transform_indices = @transform_0, window_bounds = array<i64: 1>}, {transform_indices = @transform_1, window_bounds = array<i64: 72, 512>}, {transform_indices = @transform_2, window_bounds = array<i64: 72, 512>}, {transform_indices = @transform_3, window_bounds = array<i64: 72, 512>}]} {
    %c0 = arith.constant 0 : index
    %0 = memref.load %arg1[%c0] : memref<1xf32, #tpu.memory_space<smem>>
    %c0_0 = arith.constant 0 : index
    %c0_1 = arith.constant 0 : index
    %1 = vector.load %arg3[%c0_0, %c0_1] : memref<72x512xf32, #tpu.memory_space<vmem>>, vector<72x512xf32>
    %c0_2 = arith.constant 0 : index
    %c0_3 = arith.constant 0 : index
    %2 = vector.load %arg2[%c0_2, %c0_3] : memref<72x512xf32, #tpu.memory_space<vmem>>, vector<72x512xf32>
    %3 = vector.broadcast %0 : f32 to vector<72x512xf32>
    %4 = arith.mulf %3, %2 : vector<72x512xf32>
    %cst = arith.constant 1.000000e+00 : f32
    %5 = arith.subf %cst, %0 : f32
    %6 = vector.broadcast %5 : f32 to vector<72x512xf32>
    %7 = arith.mulf %6, %1 : vector<72x512xf32>
    %8 = arith.addf %4, %7 : vector<72x512xf32>
    %c0_4 = arith.constant 0 : index
    %c0_5 = arith.constant 0 : index
    %9 = vector.load %arg4[%c0_4, %c0_5] : memref<72x512xf32, #tpu.memory_space<vmem>>, vector<72x512xf32>
    tpu.vector_store %arg4[%c0_4, %c0_5], %8 {strides = array<i32>} : memref<72x512xf32, #tpu.memory_space<vmem>>, vector<72x512xf32>,
    return
  }
  func.func @transform_0(%arg0: i32) -> i32 {
    %c0_i32 = arith.constant 0 : i32
    %c0_i32_0 = arith.constant 0 : i32
    return %c0_i32 : i32
  }
  func.func @transform_1(%arg0: i32) -> (i32, i32) {
    %c0_i32 = arith.constant 0 : i32
    %c0_i32_0 = arith.constant 0 : i32
    return %arg0, %c0_i32 : i32, i32
  }
  func.func @transform_2(%arg0: i32) -> (i32, i32) {
    %c0_i32 = arith.constant 0 : i32
    %c0_i32_0 = arith.constant 0 : i32
    return %arg0, %c0_i32 : i32, i32
  }
  func.func @transform_3(%arg0: i32) -> (i32, i32) {
    %c0_i32 = arith.constant 0 : i32
    %c0_i32_0 = arith.constant 0 : i32
    return %arg0, %c0_i32 : i32, i32
  }
}

</mosaic_0001>

<bundles_post_ra>
// kernel: _ema_update_slab.1
= control target key start
LH: loop header
LB: loop body
LE: loop exit
PB: predicated region body
PF: predicated region fallthrough
CT: control target
= control target key end

     0   :  { %9 = vsyncpa [#allocation4], 0  ;;  %s496_s0 = inlined_call_operand.<no memory space> [shape: f32[1], index: 0, kind: input, shape index: {}]   ;;  %s497_s1 = inlined_call_operand.hbm [shape: f32[72,512], index: 1, kind: input, shape index: {}, may-alias: {1,3}]   ;;  %s498_s2 = inlined_call_operand.hbm [shape: f32[72,512], index: 2, kind: input, shape index: {}]   ;;  %s499_s3 = inlined_call_operand.hbm [shape: f32[72,512], index: 3, kind: output, shape index: {}, may-alias: {1,3}]  }
   0x1   :  { %10 = vsyncpa [#allocation7], 0 }
   0x2   :  { %11 = vsyncpa [#allocation5], 0  ;;  %s18_s14 = sshll.u32 %s497_s1, 4  ;;  %s371_s15 = smov [#allocation3]   ;;  %s19_s14 = int_to_ptr.hbm [resolvable:$true] %s18_s14 }
   0x3   :  { %s20_s16 = sshll.u32 %s371_s15, 4  ;;  %s31_s19 = sshll.u32 %s498_s2, 4  ;;  %s21_s16 = int_to_ptr.vmem [resolvable:$true] %s20_s16  ;;  %s32_s19 = int_to_ptr.hbm [resolvable:$true] %s31_s19 }
   0x4   :  { %s372_s20 = smov 512   ;;  %s373_s21 = smov 32  }
   0x5   :  { %26 = dma.hbm_to_vmem [thread:$0]  %s19_s14, 4608, %s21_s16, [#allocation4], %s372_s20, %s372_s20, %s373_s21  }
   0x6   :  { %s374_s22 = smov [#allocation6]  }
   0x7   :  { %s33_s23 = sshll.u32 %s374_s22, 4  ;;  %s34_s23 = int_to_ptr.vmem [resolvable:$true] %s33_s23 }
   0x8   :  { %39 = dma.hbm_to_vmem [thread:$0]  %s32_s19, 4608, %s34_s23, [#allocation7], %s372_s20, %s372_s20, %s373_s21  }
   0x9   :  { %365 = dma.done.wait [#allocation4], 4608  }
   0xa   :  { %366 = vsyncadd [#allocation4], 4294962688 }
   0xb   :  { %367 = dma.done.wait [#allocation7], 4608  }
   0xc   :  { %368 = vsyncadd [#allocation7], 4294962688  ;;  %s158_s24 = ssub.f32 1.0, %s496_s0  ;;  %v414_v0 = vstv %s496_s0  ;;  %v49_v2 = vld [vmem:[#allocation6] sm:$0xff]  ;;  %v50_v4 = vld [vmem:[#allocation6 + $0x8] sm:$0xff]  ;;  %s375_s0 = smov [#allocation8]  }
   0xd   :  { %v85_v3 = vld [vmem:[#allocation3] sm:$0xff]  ;;  %v86_v7 = vld [vmem:[#allocation3 + $0x8] sm:$0xff]  ;;  %v51_v9 = vld [vmem:[#allocation6 + $0x10] sm:$0xff]  ;;  %s272_s27 = sshll.u32 %s375_s0, 4  ;;  %s274_s30 = sshll.u32 %s499_s3, 4  ;;  %s273_s27 = int_to_ptr.vmem [resolvable:$true] %s272_s27  ;;  %s275_s30 = int_to_ptr.hbm [resolvable:$true] %s274_s30 }
   0xe   :  { %v416_v1 = vstv %s158_s24  ;;  %v122_v5 = vmul.f32 %v414_v0, %v85_v3  ;;  %v87_v10 = vld [vmem:[#allocation3 + $0x10] sm:$0xff]  ;;  %v123_v11 = vmul.f32 %v414_v0, %v86_v7  ;;  %v52_v14 = vld [vmem:[#allocation6 + $0x18] sm:$0xff]  ;;  %v53_v16 = vld [vmem:[#allocation6 + $0x20] sm:$0xff] }
   0xf   :  { %v160_v6 = vmul.f32 %v416_v1, %v49_v2  ;;  %v161_v8 = vmul.f32 %v416_v1, %v50_v4  ;;  %v124_v12 = vmul.f32 %v414_v0, %v87_v10  ;;  %v162_v13 = vmul.f32 %v416_v1, %v51_v9  ;;  %v88_v15 = vld [vmem:[#allocation3 + $0x18] sm:$0xff]  ;;  %v89_v20 = vld [vmem:[#allocation3 + $0x20] sm:$0xff]  ;;  %v54_v22 = vld [vmem:[#allocation6 + $0x28] sm:$0xff] }
  0x10   :  { %v125_v18 = vmul.f32 %v414_v0, %v88_v15  ;;  %v163_v19 = vmul.f32 %v416_v1, %v52_v14  ;;  %v164_v21 = vmul.f32 %v416_v1, %v53_v16  ;;  %v90_v23 = vld [vmem:[#allocation3 + $0x28] sm:$0xff]  ;;  %v126_v26 = vmul.f32 %v414_v0, %v89_v20  ;;  %v55_v28 = vld [vmem:[#allocation6 + $0x30] sm:$0xff]  ;;  %v56_v30 = vld [vmem:[#allocation6 + $0x38] sm:$0xff] }
  0x11   :  { %v196_v17 = vadd.f32 %v160_v6, %v122_v5  ;;  %v197_v24 = vadd.f32 %v161_v8, %v123_v11  ;;  %v198_v25 = vadd.f32 %v162_v13, %v124_v12  ;;  %v127_v27 = vmul.f32 %v414_v0, %v90_v23  ;;  %v91_v29 = vld [vmem:[#allocation3 + $0x30] sm:$0xff]  ;;  %v92_v35 = vld [vmem:[#allocation3 + $0x38] sm:$0xff]  ;;  %v57_v36 = vld [vmem:[#allocation6 + $0x40] sm:$0xff] }
  0x12   :  { %v199_v31 = vadd.f32 %v163_v19, %v125_v18  ;;  %v165_v32 = vmul.f32 %v416_v1, %v54_v22  ;;  %v128_v33 = vmul.f32 %v414_v0, %v91_v29  ;;  %v166_v34 = vmul.f32 %v416_v1, %v55_v28  ;;  %v93_v37 = vld [vmem:[#allocation3 + $0x40] sm:$0xff]  ;;  %v58_v42 = vld [vmem:[#allocation6 + $0x48] sm:$0xff]  ;;  %v59_v44 = vld [vmem:[#allocation6 + $0x50] sm:$0xff] }
  0x13   :  { %232 = vst [vmem:[#allocation8] sm:$0xff] %v196_v17  ;;  %v200_v38 = vadd.f32 %v164_v21, %v126_v26  ;;  %v129_v39 = vmul.f32 %v414_v0, %v92_v35  ;;  %v167_v40 = vmul.f32 %v416_v1, %v56_v30  ;;  %v130_v41 = vmul.f32 %v414_v0, %v93_v37  ;;  %v94_v43 = vld [vmem:[#allocation3 + $0x48] sm:$0xff]  ;;  %v95_v49 = vld [vmem:[#allocation3 + $0x50] sm:$0xff]  ;;  %v60_v50 = vld [vmem:[#allocation6 + $0x58] sm:$0xff] }
  0x14   :  { %233 = vst [vmem:[#allocation8 + $0x8] sm:$0xff] %v197_v24  ;;  %v201_v45 = vadd.f32 %v165_v32, %v127_v27  ;;  %v202_v46 = vadd.f32 %v166_v34, %v128_v33  ;;  %v168_v47 = vmul.f32 %v416_v1, %v57_v36  ;;  %v131_v48 = vmul.f32 %v414_v0, %v94_v43  ;;  %v96_v51 = vld [vmem:[#allocation3 + $0x58] sm:$0xff]  ;;  %v61_v56 = vld [vmem:[#allocation6 + $0x60] sm:$0xff]  ;;  %v62_v58 = vld [vmem:[#allocation6 + $0x68] sm:$0xff] }
  0x15   :  { %234 = vst [vmem:[#allocation8 + $0x10] sm:$0xff] %v198_v25  ;;  %v203_v52 = vadd.f32 %v167_v40, %v129_v39  ;;  %v169_v53 = vmul.f32 %v416_v1, %v58_v42  ;;  %v132_v54 = vmul.f32 %v414_v0, %v95_v49  ;;  %v170_v55 = vmul.f32 %v416_v1, %v59_v44  ;;  %v97_v57 = vld [vmem:[#allocation3 + $0x60] sm:$0xff]  ;;  %v98_v63 = vld [vmem:[#allocation3 + $0x68] sm:$0xff]  ;;  %v63_v2 = vld [vmem:[#allocation6 + $0x70] sm:$0xff] }
  0x16   :  { %235 = vst [vmem:[#allocation8 + $0x18] sm:$0xff] %v199_v31  ;;  %v204_v59 = vadd.f32 %v168_v47, %v130_v41  ;;  %v133_v60 = vmul.f32 %v414_v0, %v96_v51  ;;  %v171_v61 = vmul.f32 %v416_v1, %v60_v50  ;;  %v134_v62 = vmul.f32 %v414_v0, %v97_v57  ;;  %v99_v3 = vld [vmem:[#allocation3 + $0x70] sm:$0xff]  ;;  %v64_v7 = vld [vmem:[#allocation6 + $0x78] sm:$0xff]  ;;  %v65_v9 = vld [vmem:[#allocation6 + $0x80] sm:$0xff] }
  0x17   :  { %236 = vst [vmem:[#allocation8 + $0x20] sm:$0xff] %v200_v38  ;;  %v205_v4 = vadd.f32 %v169_v53, %v131_v48  ;;  %v172_v5 = vmul.f32 %v416_v1, %v61_v56  ;;  %v135_v6 = vmul.f32 %v414_v0, %v98_v63  ;;  %v100_v8 = vld [vmem:[#allocation3 + $0x78] sm:$0xff]  ;;  %v206_v10 = vadd.f32 %v170_v55, %v132_v54  ;;  %v101_v14 = vld [vmem:[#allocation3 + $0x80] sm:$0xff]  ;;  %v66_v15 = vld [vmem:[#allocation6 + $0x88] sm:$0xff] }
  0x18   :  { %237 = vst [vmem:[#allocation8 + $0x28] sm:$0xff] %v201_v45  ;;  %v173_v11 = vmul.f32 %v416_v1, %v62_v58  ;;  %v136_v12 = vmul.f32 %v414_v0, %v99_v3  ;;  %v174_v13 = vmul.f32 %v416_v1, %v63_v2  ;;  %v102_v16 = vld [vmem:[#allocation3 + $0x88] sm:$0xff]  ;;  %v207_v17 = vadd.f32 %v171_v61, %v133_v60  ;;  %v67_v20 = vld [vmem:[#allocation6 + $0x90] sm:$0xff]  ;;  %v68_v25 = vld [vmem:[#allocation6 + $0x98] sm:$0xff] }
  0x19   :  { %238 = vst [vmem:[#allocation8 + $0x30] sm:$0xff] %v202_v46  ;;  %v137_v18 = vmul.f32 %v414_v0, %v100_v8  ;;  %v175_v19 = vmul.f32 %v416_v1, %v64_v7  ;;  %v103_v21 = vld [vmem:[#allocation3 + $0x90] sm:$0xff]  ;;  %v208_v22 = vadd.f32 %v172_v5, %v134_v62  ;;  %v138_v23 = vmul.f32 %v414_v0, %v101_v14  ;;  %v104_v26 = vld [vmem:[#allocation3 + $0x98] sm:$0xff]  ;;  %v69_v30 = vld [vmem:[#allocation6 + $0xa0] sm:$0xff] }
  0x1a   :  { %239 = vst [vmem:[#allocation8 + $0x38] sm:$0xff] %v203_v52  ;;  %v176_v24 = vmul.f32 %v416_v1, %v65_v9  ;;  %v209_v27 = vadd.f32 %v173_v11, %v135_v6  ;;  %v139_v28 = vmul.f32 %v414_v0, %v102_v16  ;;  %v177_v29 = vmul.f32 %v416_v1, %v66_v15  ;;  %v105_v31 = vld [vmem:[#allocation3 + $0xa0] sm:$0xff]  ;;  %v70_v35 = vld [vmem:[#allocation6 + $0xa8] sm:$0xff]  ;;  %v71_v40 = vld [vmem:[#allocation6 + $0xb0] sm:$0xff] }
  0x1b   :  { %240 = vst [vmem:[#allocation8 + $0x40] sm:$0xff] %v204_v59  ;;  %v210_v32 = vadd.f32 %v174_v13, %v136_v12  ;;  %v140_v33 = vmul.f32 %v414_v0, %v103_v21  ;;  %v178_v34 = vmul.f32 %v416_v1, %v67_v20  ;;  %v106_v36 = vld [vmem:[#allocation3 + $0xa8] sm:$0xff]  ;;  %v211_v37 = vadd.f32 %v175_v19, %v137_v18  ;;  %v107_v41 = vld [vmem:[#allocation3 + $0xb0] sm:$0xff]  ;;  %v72_v45 = vld [vmem:[#allocation6 + $0xb8] sm:$0xff] }
  0x1c   :  { %241 = vst [vmem:[#allocation8 + $0x48] sm:$0xff] %v205_v4  ;;  %v141_v38 = vmul.f32 %v414_v0, %v104_v26  ;;  %v179_v39 = vmul.f32 %v416_v1, %v68_v25  ;;  %v212_v42 = vadd.f32 %v176_v24, %v138_v23  ;;  %v142_v43 = vmul.f32 %v414_v0, %v105_v31  ;;  %v108_v46 = vld [vmem:[#allocation3 + $0xb8] sm:$0xff]  ;;  %v73_v50 = vld [vmem:[#allocation6 + $0xc0] sm:$0xff]  ;;  %v74_v55 = vld [vmem:[#allocation6 + $0xc8] sm:$0xff] }
  0x1d   :  { %242 = vst [vmem:[#allocation8 + $0x50] sm:$0xff] %v206_v10  ;;  %v180_v44 = vmul.f32 %v416_v1, %v69_v30  ;;  %v213_v47 = vadd.f32 %v177_v29, %v139_v28  ;;  %v143_v48 = vmul.f32 %v414_v0, %v106_v36  ;;  %v181_v49 = vmul.f32 %v416_v1, %v70_v35  ;;  %v109_v51 = vld [vmem:[#allocation3 + $0xc0] sm:$0xff]  ;;  %v110_v56 = vld [vmem:[#allocation3 + $0xc8] sm:$0xff]  ;;  %v75_v60 = vld [vmem:[#allocation6 + $0xd0] sm:$0xff] }
  0x1e   :  { %243 = vst [vmem:[#allocation8 + $0x58] sm:$0xff] %v207_v17  ;;  %v214_v52 = vadd.f32 %v178_v34, %v140_v33  ;;  %v144_v53 = vmul.f32 %v414_v0, %v107_v41  ;;  %v182_v54 = vmul.f32 %v416_v1, %v71_v40  ;;  %v215_v57 = vadd.f32 %v179_v39, %v141_v38  ;;  %v111_v61 = vld [vmem:[#allocation3 + $0xd0] sm:$0xff]  ;;  %v76_v3 = vld [vmem:[#allocation6 + $0xd8] sm:$0xff]  ;;  %v77_v8 = vld [vmem:[#allocation6 + $0xe0] sm:$0xff] }
  0x1f   :  { %244 = vst [vmem:[#allocation8 + $0x60] sm:$0xff] %v208_v22  ;;  %v145_v58 = vmul.f32 %v414_v0, %v108_v46  ;;  %v183_v59 = vmul.f32 %v416_v1, %v72_v45  ;;  %v216_v62 = vadd.f32 %v180_v44, %v142_v43  ;;  %v146_v63 = vmul.f32 %v414_v0, %v109_v51  ;;  %v112_v4 = vld [vmem:[#allocation3 + $0xd8] sm:$0xff]  ;;  %v113_v9 = vld [vmem:[#allocation3 + $0xe0] sm:$0xff]  ;;  %v78_v13 = vld [vmem:[#allocation6 + $0xe8] sm:$0xff] }
  0x20   :  { %245 = vst [vmem:[#allocation8 + $0x68] sm:$0xff] %v209_v27  ;;  %v184_v2 = vmul.f32 %v416_v1, %v73_v50  ;;  %v217_v5 = vadd.f32 %v181_v49, %v143_v48  ;;  %v147_v6 = vmul.f32 %v414_v0, %v110_v56  ;;  %v185_v7 = vmul.f32 %v416_v1, %v74_v55  ;;  %v114_v14 = vld [vmem:[#allocation3 + $0xe8] sm:$0xff]  ;;  %v79_v18 = vld [vmem:[#allocation6 + $0xf0] sm:$0xff]  ;;  %v80_v23 = vld [vmem:[#allocation6 + $0xf8] sm:$0xff] }
  0x21   :  { %246 = vst [vmem:[#allocation8 + $0x70] sm:$0xff] %v210_v32  ;;  %v218_v10 = vadd.f32 %v182_v54, %v144_v53  ;;  %v148_v11 = vmul.f32 %v414_v0, %v111_v61  ;;  %v186_v12 = vmul.f32 %v416_v1, %v75_v60  ;;  %v219_v15 = vadd.f32 %v183_v59, %v145_v58  ;;  %v115_v19 = vld [vmem:[#allocation3 + $0xf0] sm:$0xff]  ;;  %v116_v24 = vld [vmem:[#allocation3 + $0xf8] sm:$0xff]  ;;  %v81_v28 = vld [vmem:[#allocation6 + $0x100] sm:$0xff] }
  0x22   :  { %247 = vst [vmem:[#allocation8 + $0x78] sm:$0xff] %v211_v37  ;;  %v149_v16 = vmul.f32 %v414_v0, %v112_v4  ;;  %v187_v17 = vmul.f32 %v416_v1, %v76_v3  ;;  %v220_v20 = vadd.f32 %v184_v2, %v146_v63  ;;  %v150_v21 = vmul.f32 %v414_v0, %v113_v9  ;;  %v117_v29 = vld [vmem:[#allocation3 + $0x100] sm:$0xff]  ;;  %v82_v33 = vld [vmem:[#allocation6 + $0x108] sm:$0xff]  ;;  %v83_v38 = vld [vmem:[#allocation6 + $0x110] sm:$0xff] }
  0x23   :  { %248 = vst [vmem:[#allocation8 + $0x80] sm:$0xff] %v212_v42  ;;  %v188_v22 = vmul.f32 %v416_v1, %v77_v8  ;;  %v221_v25 = vadd.f32 %v185_v7, %v147_v6  ;;  %v151_v26 = vmul.f32 %v414_v0, %v114_v14  ;;  %v189_v27 = vmul.f32 %v416_v1, %v78_v13  ;;  %v118_v34 = vld [vmem:[#allocation3 + $0x108] sm:$0xff]  ;;  %v119_v39 = vld [vmem:[#allocation3 + $0x110] sm:$0xff]  ;;  %v84_v43 = vld [vmem:[#allocation6 + $0x118] sm:$0xff] }
  0x24   :  { %249 = vst [vmem:[#allocation8 + $0x88] sm:$0xff] %v213_v47  ;;  %v222_v30 = vadd.f32 %v186_v12, %v148_v11  ;;  %v152_v31 = vmul.f32 %v414_v0, %v115_v19  ;;  %v190_v32 = vmul.f32 %v416_v1, %v79_v18  ;;  %v223_v35 = vadd.f32 %v187_v17, %v149_v16  ;;  %v120_v44 = vld [vmem:[#allocation3 + $0x118] sm:$0xff] }
  0x25   :  { %250 = vst [vmem:[#allocation8 + $0x90] sm:$0xff] %v214_v52  ;;  %v153_v36 = vmul.f32 %v414_v0, %v116_v24  ;;  %v191_v37 = vmul.f32 %v416_v1, %v80_v23  ;;  %v224_v40 = vadd.f32 %v188_v22, %v150_v21  ;;  %v154_v41 = vmul.f32 %v414_v0, %v117_v29 }
  0x26   :  { %251 = vst [vmem:[#allocation8 + $0x98] sm:$0xff] %v215_v57  ;;  %v192_v42 = vmul.f32 %v416_v1, %v81_v28  ;;  %v225_v45 = vadd.f32 %v189_v27, %v151_v26  ;;  %v155_v46 = vmul.f32 %v414_v0, %v118_v34  ;;  %v193_v47 = vmul.f32 %v416_v1, %v82_v33 }
  0x27   :  { %252 = vst [vmem:[#allocation8 + $0xa0] sm:$0xff] %v216_v62  ;;  %v226_v48 = vadd.f32 %v190_v32, %v152_v31  ;;  %v156_v49 = vmul.f32 %v414_v0, %v119_v39  ;;  %v194_v50 = vmul.f32 %v416_v1, %v83_v38  ;;  %v227_v51 = vadd.f32 %v191_v37, %v153_v36 }
  0x28   :  { %253 = vst [vmem:[#allocation8 + $0xa8] sm:$0xff] %v217_v5  ;;  %v157_v52 = vmul.f32 %v414_v0, %v120_v44  ;;  %v195_v53 = vmul.f32 %v416_v1, %v84_v43  ;;  %v228_v54 = vadd.f32 %v192_v42, %v154_v41  ;;  %v229_v55 = vadd.f32 %v193_v47, %v155_v46 }
  0x29   :  { %254 = vst [vmem:[#allocation8 + $0xb0] sm:$0xff] %v218_v10  ;;  %v230_v56 = vadd.f32 %v194_v50, %v156_v49 }
  0x2a   :  { %255 = vst [vmem:[#allocation8 + $0xb8] sm:$0xff] %v219_v15  ;;  %v231_v57 = vadd.f32 %v195_v53, %v157_v52 }
  0x2b   :  { %256 = vst [vmem:[#allocation8 + $0xc0] sm:$0xff] %v220_v20 }
  0x2c   :  { %257 = vst [vmem:[#allocation8 + $0xc8] sm:$0xff] %v221_v25 }
  0x2d   :  { %258 = vst [vmem:[#allocation8 + $0xd0] sm:$0xff] %v222_v30 }
  0x2e   :  { %259 = vst [vmem:[#allocation8 + $0xd8] sm:$0xff] %v223_v35 }
  0x2f   :  { %260 = vst [vmem:[#allocation8 + $0xe0] sm:$0xff] %v224_v40 }
  0x30   :  { %261 = vst [vmem:[#allocation8 + $0xe8] sm:$0xff] %v225_v45 }
  0x31   :  { %262 = vst [vmem:[#allocation8 + $0xf0] sm:$0xff] %v226_v48 }
  0x32   :  { %263 = vst [vmem:[#allocation8 + $0xf8] sm:$0xff] %v227_v51 }
  0x33   :  { %264 = vst [vmem:[#allocation8 + $0x100] sm:$0xff] %v228_v54 }
  0x34   :  { %265 = vst [vmem:[#allocation8 + $0x108] sm:$0xff] %v229_v55 }
  0x35   :  { %266 = vst [vmem:[#allocation8 + $0x110] sm:$0xff] %v230_v56 }
  0x36   :  { %267 = vst [vmem:[#allocation8 + $0x118] sm:$0xff] %v231_v57 }
  0x37   :  { %280 = dma.vmem_to_hbm [thread:$0]  %s273_s27, 4608, %s275_s30, [#allocation5], %s372_s20, %s372_s20, %s373_s21  }
  0x38   :  { %369 = dma.done.wait [#allocation5], 4608  }
  0x39   :  { %370 = vsyncadd [#allocation5], 4294962688 }
  0x3a   :  { %285 = vsyncpa [#allocation4], 1 }
  0x3b   :  { %286 = vsyncpa [#allocation7], 1 }
  0x3c   :  { %287 = vsyncpa [#allocation5], 1 }

</bundles_post_ra>
